<compile_context>
chip_gen: v6e
topology: v6e:2x2x1
jax: 0.10.0
libtpu: 0.0.40
codegen_flags: <defaults>
</compile_context>

<pallas_src>
import functools
import math

import numpy as np
import jax
import jax.numpy as jnp
from jax.experimental import pallas as pl
from jax.experimental.pallas import tpu as pltpu


# ----------------------------- model config -----------------------------
DIM = 128
N_HEADS = 4
N_KV_HEADS = 2
HEAD_DIM = 32
HIDDEN_DIM = 256
NORM_EPS = 1e-6
ROPE_THETA = 1e6

BATCH = 2
SEQ = 8


# ----------------------------- kernel helpers -----------------------------
def _rmsnorm(x, w, eps):
    var = jnp.mean(x * x, axis=-1, keepdims=True)
    return x * jax.lax.rsqrt(var + eps) * w


# ----------------------------- fused block kernel -----------------------------
def block_kernel(x_ref, cosq_ref, sinq_ref, cosk_ref, sink_ref,
                 ln1_ref, wqkv_ref, bqkv_ref, wo_ref,
                 ln2_ref, wgu_ref, wd_ref,
                 o_ref, *, n_heads, n_kv_heads, head_dim, hidden_dim, eps):
    x = x_ref[...]                     # (S, D) f32 — one batch per grid step
    S = x.shape[0]
    q_w = n_heads * head_dim
    kv_w = n_kv_heads * head_dim
    rep = n_heads // n_kv_heads
    bf16 = jnp.bfloat16

    # ---- input_layernorm (RMSNorm, f32 elementwise) ----
    h = _rmsnorm(x, ln1_ref[...], eps)
    hb = h.astype(wqkv_ref.dtype)      # bf16 activations for the weight matmuls

    # ---- fused QKV projection (bf16 weights/acts, f32 accumulation).
    #      Columns: [ q | qP | k | kP | v ]; the qP/kP columns already contain
    #      rotate_half folded into the weights, and 1/sqrt(head_dim) is folded
    #      into the q columns. ----
    qkv = jnp.dot(hb, wqkv_ref[...], preferred_element_type=jnp.float32) + bqkv_ref[...]
    q_lin = qkv[:, 0:q_w]
    q_rot = qkv[:, q_w:2 * q_w]
    off = 2 * q_w
    k_lin = qkv[:, off:off + kv_w]
    k_rot = qkv[:, off + kv_w:off + 2 * kv_w]
    v = qkv[:, off + 2 * kv_w:off + 3 * kv_w]

    # ---- RoPE: pure mul-add (rotate_half already folded into q_rot/k_rot) ----
    q = q_lin * cosq_ref[...] + q_rot * sinq_ref[...]
    k = k_lin * cosk_ref[...] + k_rot * sink_ref[...]

    # ---- causal mask generated in-kernel (start_pos = 0 prefill) ----
    row = jax.lax.broadcasted_iota(jnp.int32, (S, S), 0)
    col = jax.lax.broadcasted_iota(jnp.int32, (S, S), 1)
    mask = jnp.where(row >= col, 0.0, -1e30).astype(jnp.float32)
    mask_g = jnp.tile(mask, (rep, 1))          # (rep*S, S) for the grouped heads

    wo = wo_ref[...]
    attn = jnp.zeros_like(x)                   # (S, D) f32 accumulator

    # ---- GQA attention: one score/softmax/PV per KV head (query heads that
    #      share the KV head are stacked along sublanes). Static unrolled loop.
    for hk in range(n_kv_heads):
        q_parts = [q[:, (hk * rep + r) * head_dim:(hk * rep + r + 1) * head_dim]
                   for r in range(rep)]
        qg = jnp.concatenate(q_parts, axis=0).astype(bf16)            # (rep*S, dh)
        kh = k[:, hk * head_dim:(hk + 1) * head_dim].astype(bf16)     # (S, dh)
        vh = v[:, hk * head_dim:(hk + 1) * head_dim].astype(bf16)     # (S, dh)

        s = jax.lax.dot_general(qg, kh, (((1,), (1,)), ((), ())),
                                preferred_element_type=jnp.float32)   # (rep*S, S) f32
        s = s + mask_g
        m = jnp.max(s, axis=-1, keepdims=True)
        e = jnp.exp(s - m)
        p = e * pl.reciprocal(jnp.sum(e, axis=-1, keepdims=True), approx=True)

        og = jnp.dot(p.astype(bf16), vh,
                     preferred_element_type=jnp.float32)              # (rep*S, dh)
        # un-stack grouped rows into a lane concat (S, rep*dh), push through the
        # contiguous wo slab for these heads — no full-width head concat needed.
        oh = jnp.concatenate([og[r * S:(r + 1) * S] for r in range(rep)], axis=1)
        attn = attn + jnp.dot(
            oh.astype(wo.dtype),
            wo[hk * rep * head_dim:(hk + 1) * rep * head_dim, :],
            preferred_element_type=jnp.float32)

    x1 = x + attn

    # ---- post_attention_layernorm + SwiGLU MLP (fused gate|up matmul) ----
    h2 = _rmsnorm(x1, ln2_ref[...], eps)
    h2b = h2.astype(wgu_ref.dtype)
    gu = jnp.dot(h2b, wgu_ref[...], preferred_element_type=jnp.float32)  # (S, 2H)
    g = gu[:, :hidden_dim]
    u = gu[:, hidden_dim:]
    act = g * jax.nn.sigmoid(g) * u
    ff = jnp.dot(act.astype(wd_ref.dtype), wd_ref[...],
                 preferred_element_type=jnp.float32)

    o_ref[...] = x1 + ff


# ----------------------------- wrapper -----------------------------
def _rotate_half_matrix(n_heads, head_dim):
    """Signed permutation P such that (t @ P) == HF rotate_half(t) per head."""
    width = n_heads * head_dim
    half = head_dim // 2
    P = np.zeros((width, width), np.float32)
    for h in range(n_heads):
        base = h * head_dim
        for j in range(half):
            P[base + half + j, base + j] = -1.0   # out[:, j]        = -t[:, j+half]
            P[base + j, base + half + j] = 1.0    # out[:, half + j] = +t[:, j]
    return jnp.asarray(P)


def qwen2_block(x, cos_emb, sin_emb, params):
    """x: (B, S, D) float32. cos/sin: (S, head_dim). Returns (B, S, D) float32."""
    B, S, D = x.shape
    scale = 1.0 / math.sqrt(HEAD_DIM)
    bf16 = jnp.bfloat16

    x2 = x.reshape(B * S, D)

    # rotate_half folded into weights; 1/sqrt(head_dim) folded into q columns.
    P_q = _rotate_half_matrix(N_HEADS, HEAD_DIM)
    P_k = _rotate_half_matrix(N_KV_HEADS, HEAD_DIM)
    wq_s = params["wq"] * scale
    bq_s = params["bq"] * scale

    w_qkv = jnp.concatenate(
        [wq_s, wq_s @ P_q, params["wk"], params["wk"] @ P_k, params["wv"]],
        axis=1).astype(bf16)                                   # (D, 2*Qw + 3*KVw) = (128, 448)
    b_qkv = jnp.concatenate(
        [bq_s, bq_s @ P_q, params["bk"], params["bk"] @ P_k, params["bv"]],
        axis=1).astype(jnp.float32)                            # (1, 448) — bias stays f32
    w_gu = jnp.concatenate([params["wg"], params["wu"]], axis=1).astype(bf16)   # (128, 512)

    # RoPE tables pre-tiled to the projection widths (positions 0..S-1,
    # identical for every batch at start_pos=0).
    cos_q = jnp.tile(cos_emb, (1, N_HEADS))      # (S, 128)
    sin_q = jnp.tile(sin_emb, (1, N_HEADS))
    cos_k = jnp.tile(cos_emb, (1, N_KV_HEADS))   # (S, 64)
    sin_k = jnp.tile(sin_emb, (1, N_KV_HEADS))

    op_inputs = [
        x2, cos_q, sin_q, cos_k, sin_k,
        params["ln1_w"], w_qkv, b_qkv, params["wo"].astype(bf16),
        params["ln2_w"], w_gu, params["wd"].astype(bf16),
    ]

    def resident(a):
        """Full-array block with a constant block index -> stays resident across steps."""
        nd = a.ndim
        return pl.BlockSpec(a.shape, lambda b, _nd=nd: (0,) * _nd)

    in_specs = [
        pl.BlockSpec((S, D), lambda b: (b, 0)),        # x: one batch per step
        resident(cos_q), resident(sin_q), resident(cos_k), resident(sin_k),
        resident(params["ln1_w"]), resident(w_qkv), resident(b_qkv),
        resident(params["wo"]),
        resident(params["ln2_w"]), resident(w_gu), resident(params["wd"]),
    ]

    kernel = functools.partial(
        block_kernel,
        n_heads=N_HEADS, n_kv_heads=N_KV_HEADS, head_dim=HEAD_DIM,
        hidden_dim=HIDDEN_DIM, eps=NORM_EPS,
    )

    out = pl.pallas_call(
        kernel,
        out_shape=jax.ShapeDtypeStruct((B * S, D), jnp.float32),
        grid=(B,),                                     # one step per batch; parallel on v7x megacore
        in_specs=in_specs,
        out_specs=pl.BlockSpec((S, D), lambda b: (b, 0)),
        compiler_params=pltpu.CompilerParams(dimension_semantics=("parallel",)),
    )(*op_inputs)
    return out.reshape(B, S, D)


# ----------------------------- pure-JAX reference (f32) -----------------------------
def reference_block(x, cos, sin, p):
    B, S, D = x.shape
    rep = N_HEADS // N_KV_HEADS
    half = HEAD_DIM // 2
    mask = jnp.triu(jnp.full((S, S), -1e30, jnp.float32), k=1)

    def rms(v, w):
        return v * jax.lax.rsqrt(jnp.mean(v * v, -1, keepdims=True) + NORM_EPS) * w

    def rope4(t):  # t: (B, S, H, Dh)
        c = cos[None, :, None, :]
        s = sin[None, :, None, :]
        t1, t2 = t[..., :half], t[..., half:]
        return t * c + jnp.concatenate([-t2, t1], axis=-1) * s

    h = rms(x, p["ln1_w"][0])
    q = (h @ p["wq"] + p["bq"][0]).reshape(B, S, N_HEADS, HEAD_DIM)
    k = (h @ p["wk"] + p["bk"][0]).reshape(B, S, N_KV_HEADS, HEAD_DIM)
    v = (h @ p["wv"] + p["bv"][0]).reshape(B, S, N_KV_HEADS, HEAD_DIM)
    q, k = rope4(q), rope4(k)
    k = jnp.repeat(k, rep, axis=2)
    v = jnp.repeat(v, rep, axis=2)
    s = jnp.einsum("bqhd,bkhd->bhqk", q, k) / math.sqrt(HEAD_DIM)
    s = s + mask[None, None]
    pr = jax.nn.softmax(s, axis=-1)
    attn = jnp.einsum("bhqk,bkhd->bqhd", pr, v).reshape(B, S, N_HEADS * HEAD_DIM)
    x1 = x + attn @ p["wo"]
    h2 = rms(x1, p["ln2_w"][0])
    g = h2 @ p["wg"]
    u = h2 @ p["wu"]
    return x1 + (g * jax.nn.sigmoid(g) * u) @ p["wd"]


# ----------------------------- setup & run -----------------------------
def make_params(key):
    ks = jax.random.split(key, 8)
    scale = 0.02
    return {
        "ln1_w": jnp.ones((1, DIM), jnp.float32),
        "wq": scale * jax.random.normal(ks[0], (DIM, N_HEADS * HEAD_DIM), jnp.float32),
        "bq": scale * jax.random.normal(ks[1], (1, N_HEADS * HEAD_DIM), jnp.float32),
        "wk": scale * jax.random.normal(ks[2], (DIM, N_KV_HEADS * HEAD_DIM), jnp.float32),
        "bk": scale * jax.random.normal(ks[3], (1, N_KV_HEADS * HEAD_DIM), jnp.float32),
        "wv": scale * jax.random.normal(ks[4], (DIM, N_KV_HEADS * HEAD_DIM), jnp.float32),
        "bv": scale * jax.random.normal(ks[5], (1, N_KV_HEADS * HEAD_DIM), jnp.float32),
        "wo": scale * jax.random.normal(ks[6], (N_HEADS * HEAD_DIM, DIM), jnp.float32),
        "ln2_w": jnp.ones((1, DIM), jnp.float32),
        "wg": scale * jax.random.normal(ks[7], (DIM, HIDDEN_DIM), jnp.float32),
        "wu": scale * jax.random.normal(jax.random.fold_in(key, 100), (DIM, HIDDEN_DIM), jnp.float32),
        "wd": scale * jax.random.normal(jax.random.fold_in(key, 101), (HIDDEN_DIM, DIM), jnp.float32),
    }


def make_rope(seq_len, start_pos=0):
    half = HEAD_DIM // 2
    inv_freq = 1.0 / (ROPE_THETA ** (jnp.arange(0, half, dtype=jnp.float32) * 2.0 / HEAD_DIM))
    pos = jnp.arange(start_pos, start_pos + seq_len, dtype=jnp.float32)
    freqs = pos[:, None] * inv_freq[None, :]          # (S, half)
    emb = jnp.concatenate([freqs, freqs], axis=-1)    # (S, head_dim)
    return jnp.cos(emb), jnp.sin(emb)


if __name__ == "__main__":
    key = jax.random.PRNGKey(0)
    kx, kp = jax.random.split(key)

    x = jax.random.normal(kx, (BATCH, SEQ, DIM), jnp.float32)
    params = make_params(kp)
    cos, sin = make_rope(SEQ, start_pos=0)   # start_pos = 0 prefill

    out = jax.block_until_ready(qwen2_block(x, cos, sin, params))
    ref = jax.block_until_ready(reference_block(x, cos, sin, params))

    assert out.shape == (BATCH, SEQ, DIM)
    # kernel uses bf16 weights and bf16 MXU operands (f32 accumulation); ref is pure f32
    assert jnp.allclose(out, ref, atol=2e-2, rtol=2e-2), "mismatch vs reference"

    print("KERNEL_OK")
</pallas_src>

<mosaic_0001>
module attributes {stable_mosaic.version = 11 : i64} {
  func.func @block_kernel(%arg0: i32, %arg1: memref<8x128xf32, #tpu.memory_space<vmem>>, %arg2: memref<8x128xf32, #tpu.memory_space<vmem>>, %arg3: memref<8x128xf32, #tpu.memory_space<vmem>>, %arg4: memref<8x64xf32, #tpu.memory_space<vmem>>, %arg5: memref<8x64xf32, #tpu.memory_space<vmem>>, %arg6: memref<1x128xf32, #tpu.memory_space<vmem>>, %arg7: memref<128x448xbf16, #tpu.memory_space<vmem>>, %arg8: memref<1x448xf32, #tpu.memory_space<vmem>>, %arg9: memref<128x128xbf16, #tpu.memory_space<vmem>>, %arg10: memref<1x128xf32, #tpu.memory_space<vmem>>, %arg11: memref<128x512xbf16, #tpu.memory_space<vmem>>, %arg12: memref<256x128xbf16, #tpu.memory_space<vmem>>, %arg13: memref<8x128xf32, #tpu.memory_space<vmem>>) attributes {dimension_semantics = [#tpu.dimension_semantics<parallel>], iteration_bounds = array<i64: 2>, scalar_prefetch = 0 : i64, scratch_operands = 0 : i64, tpu.core_type = #tpu.core_type<tc>, window_params = [{transform_indices = @transform_0, window_bounds = array<i64: 8, 128>}, {pipeline_mode = #tpu.pipeline_mode<synchronous>, transform_indices = @transform_1, window_bounds = array<i64: 8, 128>}, {pipeline_mode = #tpu.pipeline_mode<synchronous>, transform_indices = @transform_2, window_bounds = array<i64: 8, 128>}, {pipeline_mode = #tpu.pipeline_mode<synchronous>, transform_indices = @transform_3, window_bounds = array<i64: 8, 64>}, {pipeline_mode = #tpu.pipeline_mode<synchronous>, transform_indices = @transform_4, window_bounds = array<i64: 8, 64>}, {pipeline_mode = #tpu.pipeline_mode<synchronous>, transform_indices = @transform_5, window_bounds = array<i64: 1, 128>}, {pipeline_mode = #tpu.pipeline_mode<synchronous>, transform_indices = @transform_6, window_bounds = array<i64: 128, 448>}, {pipeline_mode = #tpu.pipeline_mode<synchronous>, transform_indices = @transform_7, window_bounds = array<i64: 1, 448>}, {pipeline_mode = #tpu.pipeline_mode<synchronous>, transform_indices = @transform_8, window_bounds = array<i64: 128, 128>}, {pipeline_mode = #tpu.pipeline_mode<synchronous>, transform_indices = @transform_9, window_bounds = array<i64: 1, 128>}, {pipeline_mode = #tpu.pipeline_mode<synchronous>, transform_indices = @transform_10, window_bounds = array<i64: 128, 512>}, {pipeline_mode = #tpu.pipeline_mode<synchronous>, transform_indices = @transform_11, window_bounds = array<i64: 256, 128>}, {transform_indices = @transform_12, window_bounds = array<i64: 8, 128>}]} {
    %c0 = arith.constant 0 : index
    %c0_0 = arith.constant 0 : index
    %0 = vector.load %arg1[%c0, %c0_0] : memref<8x128xf32, #tpu.memory_space<vmem>>, vector<8x128xf32>
    %c0_1 = arith.constant 0 : index
    %c0_2 = arith.constant 0 : index
    %1 = vector.load %arg6[%c0_1, %c0_2] : memref<1x128xf32, #tpu.memory_space<vmem>>, vector<1x128xf32>
    %2 = arith.mulf %0, %0 : vector<8x128xf32>
    %cst = arith.constant dense<0.000000e+00> : vector<8xf32>
    %3 = vector.multi_reduction <add>, %2, %cst [1] : vector<8x128xf32> to vector<8xf32>
    %4 = vector.shape_cast %3 : vector<8xf32> to vector<8x1xf32>
    %cst_3 = arith.constant 1.280000e+02 : f32
    %5 = vector.broadcast %cst_3 : f32 to vector<8x1xf32>
    %6 = arith.divf %4, %5 : vector<8x1xf32>
    %cst_4 = arith.constant 9.99999997E-7 : f32
    %7 = vector.broadcast %cst_4 : f32 to vector<8x1xf32>
    %8 = arith.addf %6, %7 : vector<8x1xf32>
    %9 = math.rsqrt %8 : vector<8x1xf32>
    %10 = vector.broadcast %9 : vector<8x1xf32> to vector<8x128xf32>
    %11 = arith.mulf %0, %10 : vector<8x128xf32>
    %12 = vector.broadcast %1 : vector<1x128xf32> to vector<8x128xf32>
    %13 = arith.mulf %11, %12 : vector<8x128xf32>
    %14 = arith.truncf %13 : vector<8x128xf32> to vector<8x128xbf16>
    %c0_5 = arith.constant 0 : index
    %c0_6 = arith.constant 0 : index
    %15 = vector.load %arg7[%c0_5, %c0_6] : memref<128x448xbf16, #tpu.memory_space<vmem>>, vector<128x448xbf16>
    %cst_7 = arith.constant dense<0.000000e+00> : vector<8x448xf32>
    %16 = tpu.matmul %14, %15, %cst_7 {dimension_numbers = #tpu.dot_dimension_numbers<[1], [0], [0], [1], [0, 0, 1, 1], [], []>} : vector<8x128xbf16>, vector<128x448xbf16>, vector<8x448xf32> -> vector<8x448xf32>
    %c0_8 = arith.constant 0 : index
    %c0_9 = arith.constant 0 : index
    %17 = vector.load %arg8[%c0_8, %c0_9] : memref<1x448xf32, #tpu.memory_space<vmem>>, vector<1x448xf32>
    %18 = vector.broadcast %17 : vector<1x448xf32> to vector<8x448xf32>
    %19 = arith.addf %16, %18 : vector<8x448xf32>
    %20 = vector.extract_strided_slice %19 {offsets = [0, 0], sizes = [8, 128], strides = [1, 1]} : vector<8x448xf32> to vector<8x128xf32>
    %21 = vector.extract_strided_slice %19 {offsets = [0, 128], sizes = [8, 128], strides = [1, 1]} : vector<8x448xf32> to vector<8x128xf32>
    %22 = vector.extract_strided_slice %19 {offsets = [0, 256], sizes = [8, 64], strides = [1, 1]} : vector<8x448xf32> to vector<8x64xf32>
    %23 = vector.extract_strided_slice %19 {offsets = [0, 320], sizes = [8, 64], strides = [1, 1]} : vector<8x448xf32> to vector<8x64xf32>
    %24 = vector.extract_strided_slice %19 {offsets = [0, 384], sizes = [8, 64], strides = [1, 1]} : vector<8x448xf32> to vector<8x64xf32>
    %c0_10 = arith.constant 0 : index
    %c0_11 = arith.constant 0 : index
    %25 = vector.load %arg2[%c0_10, %c0_11] : memref<8x128xf32, #tpu.memory_space<vmem>>, vector<8x128xf32>
    %26 = arith.mulf %20, %25 : vector<8x128xf32>
    %c0_12 = arith.constant 0 : index
    %c0_13 = arith.constant 0 : index
    %27 = vector.load %arg3[%c0_12, %c0_13] : memref<8x128xf32, #tpu.memory_space<vmem>>, vector<8x128xf32>
    %28 = arith.mulf %21, %27 : vector<8x128xf32>
    %29 = arith.addf %26, %28 : vector<8x128xf32>
    %c0_14 = arith.constant 0 : index
    %c0_15 = arith.constant 0 : index
    %30 = vector.load %arg4[%c0_14, %c0_15] : memref<8x64xf32, #tpu.memory_space<vmem>>, vector<8x64xf32>
    %31 = arith.mulf %22, %30 : vector<8x64xf32>
    %c0_16 = arith.constant 0 : index
    %c0_17 = arith.constant 0 : index
    %32 = vector.load %arg5[%c0_16, %c0_17] : memref<8x64xf32, #tpu.memory_space<vmem>>, vector<8x64xf32>
    %33 = arith.mulf %23, %32 : vector<8x64xf32>
    %34 = arith.addf %31, %33 : vector<8x64xf32>
    %35 = tpu.iota {dimensions = array<i32: 0>} : vector<8x8xi32>
    %36 = tpu.iota {dimensions = array<i32: 1>} : vector<8x8xi32>
    %37 = arith.cmpi sge, %35, %36 : vector<8x8xi32>
    %cst_18 = arith.constant 0.000000e+00 : f32
    %cst_19 = arith.constant -1.000000e+30 : f32
    %38 = vector.broadcast %cst_18 : f32 to vector<8x8xf32>
    %39 = vector.broadcast %cst_19 : f32 to vector<8x8xf32>
    %40 = arith.select %37, %38, %39 : vector<8x8xi1>, vector<8x8xf32>
    %41 = tpu.concatenate %40, %40 in 0 : vector<8x8xf32>, vector<8x8xf32> -> vector<16x8xf32>
    %c0_20 = arith.constant 0 : index
    %c0_21 = arith.constant 0 : index
    %42 = vector.load %arg9[%c0_20, %c0_21] : memref<128x128xbf16, #tpu.memory_space<vmem>>, vector<128x128xbf16>
    %cst_22 = arith.constant 0.000000e+00 : f32
    %43 = vector.broadcast %cst_22 : f32 to vector<8x128xf32>
    %44 = vector.extract_strided_slice %29 {offsets = [0, 0], sizes = [8, 32], strides = [1, 1]} : vector<8x128xf32> to vector<8x32xf32>
    %45 = vector.extract_strided_slice %29 {offsets = [0, 32], sizes = [8, 32], strides = [1, 1]} : vector<8x128xf32> to vector<8x32xf32>
    %46 = tpu.concatenate %44, %45 in 0 : vector<8x32xf32>, vector<8x32xf32> -> vector<16x32xf32>
    %47 = arith.truncf %46 : vector<16x32xf32> to vector<16x32xbf16>
    %48 = vector.extract_strided_slice %34 {offsets = [0, 0], sizes = [8, 32], strides = [1, 1]} : vector<8x64xf32> to vector<8x32xf32>
    %49 = arith.truncf %48 : vector<8x32xf32> to vector<8x32xbf16>
    %50 = vector.extract_strided_slice %24 {offsets = [0, 0], sizes = [8, 32], strides = [1, 1]} : vector<8x64xf32> to vector<8x32xf32>
    %51 = arith.truncf %50 : vector<8x32xf32> to vector<8x32xbf16>
    %cst_23 = arith.constant dense<0.000000e+00> : vector<16x8xf32>
    %52 = tpu.matmul %47, %49, %cst_23 {dimension_numbers = #tpu.dot_dimension_numbers<[1], [1], [0], [0], [0, 0, 1, 0], [], []>} : vector<16x32xbf16>, vector<8x32xbf16>, vector<16x8xf32> -> vector<16x8xf32>
    %53 = arith.addf %52, %41 : vector<16x8xf32>
    %cst_24 = arith.constant dense<0xFF800000> : vector<16xf32>
    %54 = vector.multi_reduction <maximumf>, %53, %cst_24 [1] : vector<16x8xf32> to vector<16xf32>
    %55 = vector.shape_cast %54 : vector<16xf32> to vector<16x1xf32>
    %56 = vector.broadcast %55 : vector<16x1xf32> to vector<16x8xf32>
    %57 = arith.subf %53, %56 : vector<16x8xf32>
    %58 = math.exp %57 : vector<16x8xf32>
    %cst_25 = arith.constant dense<0.000000e+00> : vector<16xf32>
    %59 = vector.multi_reduction <add>, %58, %cst_25 [1] : vector<16x8xf32> to vector<16xf32>
    %60 = vector.shape_cast %59 : vector<16xf32> to vector<16x1xf32>
    %61 = tpu.reciprocal %60 {approx = true} : vector<16x1xf32> -> vector<16x1xf32>
    %62 = vector.broadcast %61 : vector<16x1xf32> to vector<16x8xf32>
    %63 = arith.mulf %58, %62 : vector<16x8xf32>
    %64 = arith.truncf %63 : vector<16x8xf32> to vector<16x8xbf16>
    %cst_26 = arith.constant dense<0.000000e+00> : vector<16x32xf32>
    %65 = tpu.matmul %64, %51, %cst_26 {dimension_numbers = #tpu.dot_dimension_numbers<[1], [0], [0], [1], [0, 0, 1, 1], [], []>} : vector<16x8xbf16>, vector<8x32xbf16>, vector<16x32xf32> -> vector<16x32xf32>
    %66 = vector.extract_strided_slice %65 {offsets = [0, 0], sizes = [8, 32], strides = [1, 1]} : vector<16x32xf32> to vector<8x32xf32>
    %67 = vector.extract_strided_slice %65 {offsets = [8, 0], sizes = [8, 32], strides = [1, 1]} : vector<16x32xf32> to vector<8x32xf32>
    %68 = tpu.concatenate %66, %67 in 1 : vector<8x32xf32>, vector<8x32xf32> -> vector<8x64xf32>
    %69 = arith.truncf %68 : vector<8x64xf32> to vector<8x64xbf16>
    %70 = vector.extract_strided_slice %42 {offsets = [0, 0], sizes = [64, 128], strides = [1, 1]} : vector<128x128xbf16> to vector<64x128xbf16>
    %cst_27 = arith.constant dense<0.000000e+00> : vector<8x128xf32>
    %71 = tpu.matmul %69, %70, %cst_27 {dimension_numbers = #tpu.dot_dimension_numbers<[1], [0], [0], [1], [0, 0, 1, 1], [], []>} : vector<8x64xbf16>, vector<64x128xbf16>, vector<8x128xf32> -> vector<8x128xf32>
    %72 = arith.addf %43, %71 : vector<8x128xf32>
    %73 = vector.extract_strided_slice %29 {offsets = [0, 64], sizes = [8, 32], strides = [1, 1]} : vector<8x128xf32> to vector<8x32xf32>
    %74 = vector.extract_strided_slice %29 {offsets = [0, 96], sizes = [8, 32], strides = [1, 1]} : vector<8x128xf32> to vector<8x32xf32>
    %75 = tpu.concatenate %73, %74 in 0 : vector<8x32xf32>, vector<8x32xf32> -> vector<16x32xf32>
    %76 = arith.truncf %75 : vector<16x32xf32> to vector<16x32xbf16>
    %77 = vector.extract_strided_slice %34 {offsets = [0, 32], sizes = [8, 32], strides = [1, 1]} : vector<8x64xf32> to vector<8x32xf32>
    %78 = arith.truncf %77 : vector<8x32xf32> to vector<8x32xbf16>
    %79 = vector.extract_strided_slice %24 {offsets = [0, 32], sizes = [8, 32], strides = [1, 1]} : vector<8x64xf32> to vector<8x32xf32>
    %80 = arith.truncf %79 : vector<8x32xf32> to vector<8x32xbf16>
    %cst_28 = arith.constant dense<0.000000e+00> : vector<16x8xf32>
    %81 = tpu.matmul %76, %78, %cst_28 {dimension_numbers = #tpu.dot_dimension_numbers<[1], [1], [0], [0], [0, 0, 1, 0], [], []>} : vector<16x32xbf16>, vector<8x32xbf16>, vector<16x8xf32> -> vector<16x8xf32>
    %82 = arith.addf %81, %41 : vector<16x8xf32>
    %cst_29 = arith.constant dense<0xFF800000> : vector<16xf32>
    %83 = vector.multi_reduction <maximumf>, %82, %cst_29 [1] : vector<16x8xf32> to vector<16xf32>
    %84 = vector.shape_cast %83 : vector<16xf32> to vector<16x1xf32>
    %85 = vector.broadcast %84 : vector<16x1xf32> to vector<16x8xf32>
    %86 = arith.subf %82, %85 : vector<16x8xf32>
    %87 = math.exp %86 : vector<16x8xf32>
    %cst_30 = arith.constant dense<0.000000e+00> : vector<16xf32>
    %88 = vector.multi_reduction <add>, %87, %cst_30 [1] : vector<16x8xf32> to vector<16xf32>
    %89 = vector.shape_cast %88 : vector<16xf32> to vector<16x1xf32>
    %90 = tpu.reciprocal %89 {approx = true} : vector<16x1xf32> -> vector<16x1xf32>
    %91 = vector.broadcast %90 : vector<16x1xf32> to vector<16x8xf32>
    %92 = arith.mulf %87, %91 : vector<16x8xf32>
    %93 = arith.truncf %92 : vector<16x8xf32> to vector<16x8xbf16>
    %cst_31 = arith.constant dense<0.000000e+00> : vector<16x32xf32>
    %94 = tpu.matmul %93, %80, %cst_31 {dimension_numbers = #tpu.dot_dimension_numbers<[1], [0], [0], [1], [0, 0, 1, 1], [], []>} : vector<16x8xbf16>, vector<8x32xbf16>, vector<16x32xf32> -> vector<16x32xf32>
    %95 = vector.extract_strided_slice %94 {offsets = [0, 0], sizes = [8, 32], strides = [1, 1]} : vector<16x32xf32> to vector<8x32xf32>
    %96 = vector.extract_strided_slice %94 {offsets = [8, 0], sizes = [8, 32], strides = [1, 1]} : vector<16x32xf32> to vector<8x32xf32>
    %97 = tpu.concatenate %95, %96 in 1 : vector<8x32xf32>, vector<8x32xf32> -> vector<8x64xf32>
    %98 = arith.truncf %97 : vector<8x64xf32> to vector<8x64xbf16>
    %99 = vector.extract_strided_slice %42 {offsets = [64, 0], sizes = [64, 128], strides = [1, 1]} : vector<128x128xbf16> to vector<64x128xbf16>
    %cst_32 = arith.constant dense<0.000000e+00> : vector<8x128xf32>
    %100 = tpu.matmul %98, %99, %cst_32 {dimension_numbers = #tpu.dot_dimension_numbers<[1], [0], [0], [1], [0, 0, 1, 1], [], []>} : vector<8x64xbf16>, vector<64x128xbf16>, vector<8x128xf32> -> vector<8x128xf32>
    %101 = arith.addf %72, %100 : vector<8x128xf32>
    %102 = arith.addf %0, %101 : vector<8x128xf32>
    %c0_33 = arith.constant 0 : index
    %c0_34 = arith.constant 0 : index
    %103 = vector.load %arg10[%c0_33, %c0_34] : memref<1x128xf32, #tpu.memory_space<vmem>>, vector<1x128xf32>
    %104 = arith.mulf %102, %102 : vector<8x128xf32>
    %cst_35 = arith.constant dense<0.000000e+00> : vector<8xf32>
    %105 = vector.multi_reduction <add>, %104, %cst_35 [1] : vector<8x128xf32> to vector<8xf32>
    %106 = vector.shape_cast %105 : vector<8xf32> to vector<8x1xf32>
    %cst_36 = arith.constant 1.280000e+02 : f32
    %107 = vector.broadcast %cst_36 : f32 to vector<8x1xf32>
    %108 = arith.divf %106, %107 : vector<8x1xf32>
    %cst_37 = arith.constant 9.99999997E-7 : f32
    %109 = vector.broadcast %cst_37 : f32 to vector<8x1xf32>
    %110 = arith.addf %108, %109 : vector<8x1xf32>
    %111 = math.rsqrt %110 : vector<8x1xf32>
    %112 = vector.broadcast %111 : vector<8x1xf32> to vector<8x128xf32>
    %113 = arith.mulf %102, %112 : vector<8x128xf32>
    %114 = vector.broadcast %103 : vector<1x128xf32> to vector<8x128xf32>
    %115 = arith.mulf %113, %114 : vector<8x128xf32>
    %116 = arith.truncf %115 : vector<8x128xf32> to vector<8x128xbf16>
    %c0_38 = arith.constant 0 : index
    %c0_39 = arith.constant 0 : index
    %117 = vector.load %arg11[%c0_38, %c0_39] : memref<128x512xbf16, #tpu.memory_space<vmem>>, vector<128x512xbf16>
    %cst_40 = arith.constant dense<0.000000e+00> : vector<8x512xf32>
    %118 = tpu.matmul %116, %117, %cst_40 {dimension_numbers = #tpu.dot_dimension_numbers<[1], [0], [0], [1], [0, 0, 1, 1], [], []>} : vector<8x128xbf16>, vector<128x512xbf16>, vector<8x512xf32> -> vector<8x512xf32>
    %119 = vector.extract_strided_slice %118 {offsets = [0, 0], sizes = [8, 256], strides = [1, 1]} : vector<8x512xf32> to vector<8x256xf32>
    %120 = vector.extract_strided_slice %118 {offsets = [0, 256], sizes = [8, 256], strides = [1, 1]} : vector<8x512xf32> to vector<8x256xf32>
    %121 = arith.negf %119 : vector<8x256xf32>
    %122 = math.exp %121 : vector<8x256xf32>
    %cst_41 = arith.constant 1.000000e+00 : f32
    %123 = vector.broadcast %cst_41 : f32 to vector<8x256xf32>
    %124 = arith.addf %123, %122 : vector<8x256xf32>
    %125 = arith.divf %123, %124 : vector<8x256xf32>
    %126 = arith.mulf %119, %125 : vector<8x256xf32>
    %127 = arith.mulf %126, %120 : vector<8x256xf32>
    %128 = arith.truncf %127 : vector<8x256xf32> to vector<8x256xbf16>
    %c0_42 = arith.constant 0 : index
    %c0_43 = arith.constant 0 : index
    %129 = vector.load %arg12[%c0_42, %c0_43] : memref<256x128xbf16, #tpu.memory_space<vmem>>, vector<256x128xbf16>
    %cst_44 = arith.constant dense<0.000000e+00> : vector<8x128xf32>
    %130 = tpu.matmul %128, %129, %cst_44 {dimension_numbers = #tpu.dot_dimension_numbers<[1], [0], [0], [1], [0, 0, 1, 1], [], []>} : vector<8x256xbf16>, vector<256x128xbf16>, vector<8x128xf32> -> vector<8x128xf32>
    %131 = arith.addf %102, %130 : vector<8x128xf32>
    %c0_45 = arith.constant 0 : index
    %c0_46 = arith.constant 0 : index
    %132 = vector.load %arg13[%c0_45, %c0_46] : memref<8x128xf32, #tpu.memory_space<vmem>>, vector<8x128xf32>
    tpu.vector_store %arg13[%c0_45, %c0_46], %131 {strides = array<i32>} : memref<8x128xf32, #tpu.memory_space<vmem>>, vector<8x128xf32>,
    return
  }
  func.func @transform_0(%arg0: i32) -> (i32, i32) {
    %c0_i32 = arith.constant 0 : i32
    %c0_i32_0 = arith.constant 0 : i32
    return %arg0, %c0_i32 : i32, i32
  }
  func.func @transform_1(%arg0: i32) -> (i32, i32) {
    %c0_i32 = arith.constant 0 : i32
    %c0_i32_0 = arith.constant 0 : i32
    %c0_i32_1 = arith.constant 0 : i32
    return %c0_i32, %c0_i32_0 : i32, i32
  }
  func.func @transform_2(%arg0: i32) -> (i32, i32) {
    %c0_i32 = arith.constant 0 : i32
    %c0_i32_0 = arith.constant 0 : i32
    %c0_i32_1 = arith.constant 0 : i32
    return %c0_i32, %c0_i32_0 : i32, i32
  }
  func.func @transform_3(%arg0: i32) -> (i32, i32) {
    %c0_i32 = arith.constant 0 : i32
    %c0_i32_0 = arith.constant 0 : i32
    %c0_i32_1 = arith.constant 0 : i32
    return %c0_i32, %c0_i32_0 : i32, i32
  }
  func.func @transform_4(%arg0: i32) -> (i32, i32) {
    %c0_i32 = arith.constant 0 : i32
    %c0_i32_0 = arith.constant 0 : i32
    %c0_i32_1 = arith.constant 0 : i32
    return %c0_i32, %c0_i32_0 : i32, i32
  }
  func.func @transform_5(%arg0: i32) -> (i32, i32) {
    %c0_i32 = arith.constant 0 : i32
    %c0_i32_0 = arith.constant 0 : i32
    %c0_i32_1 = arith.constant 0 : i32
    return %c0_i32, %c0_i32_0 : i32, i32
  }
  func.func @transform_6(%arg0: i32) -> (i32, i32) {
    %c0_i32 = arith.constant 0 : i32
    %c0_i32_0 = arith.constant 0 : i32
    %c0_i32_1 = arith.constant 0 : i32
    return %c0_i32, %c0_i32_0 : i32, i32
  }
  func.func @transform_7(%arg0: i32) -> (i32, i32) {
    %c0_i32 = arith.constant 0 : i32
    %c0_i32_0 = arith.constant 0 : i32
    %c0_i32_1 = arith.constant 0 : i32
    return %c0_i32, %c0_i32_0 : i32, i32
  }
  func.func @transform_8(%arg0: i32) -> (i32, i32) {
    %c0_i32 = arith.constant 0 : i32
    %c0_i32_0 = arith.constant 0 : i32
    %c0_i32_1 = arith.constant 0 : i32
    return %c0_i32, %c0_i32_0 : i32, i32
  }
  func.func @transform_9(%arg0: i32) -> (i32, i32) {
    %c0_i32 = arith.constant 0 : i32
    %c0_i32_0 = arith.constant 0 : i32
    %c0_i32_1 = arith.constant 0 : i32
    return %c0_i32, %c0_i32_0 : i32, i32
  }
  func.func @transform_10(%arg0: i32) -> (i32, i32) {
    %c0_i32 = arith.constant 0 : i32
    %c0_i32_0 = arith.constant 0 : i32
    %c0_i32_1 = arith.constant 0 : i32
    return %c0_i32, %c0_i32_0 : i32, i32
  }
  func.func @transform_11(%arg0: i32) -> (i32, i32) {
    %c0_i32 = arith.constant 0 : i32
    %c0_i32_0 = arith.constant 0 : i32
    %c0_i32_1 = arith.constant 0 : i32
    return %c0_i32, %c0_i32_0 : i32, i32
  }
  func.func @transform_12(%arg0: i32) -> (i32, i32) {
    %c0_i32 = arith.constant 0 : i32
    %c0_i32_0 = arith.constant 0 : i32
    return %arg0, %c0_i32 : i32, i32
  }
}

</mosaic_0001>

<bundles_post_ra>
// kernel: tpu_custom_call.1
= control target key start
LH: loop header
LB: loop body
LE: loop exit
PB: predicated region body
PF: predicated region fallthrough
CT: control target
= control target key end

     0   :  { %s2780_s0 = inlined_call_operand.vmem [shape: f32[16,128], index: 0, kind: input, shape index: {}]   ;;  %s2781_s1 = inlined_call_operand.vmem [shape: f32[8,128], index: 1, kind: input, shape index: {}]   ;;  %s2782_s2 = inlined_call_operand.vmem [shape: f32[8,128], index: 2, kind: input, shape index: {}]   ;;  %s2783_s3 = inlined_call_operand.vmem [shape: f32[8,64], index: 3, kind: input, shape index: {}]   ;;  %s2784_s4 = inlined_call_operand.vmem [shape: f32[8,64], index: 4, kind: input, shape index: {}]   ;;  %s2785_s5 = inlined_call_operand.vmem [shape: f32[1,128], index: 5, kind: input, shape index: {}]   ;;  %s2786_s6 = inlined_call_operand.vmem [shape: bf16[128,448], index: 6, kind: input, shape index: {}]   ;;  %s2787_s7 = inlined_call_operand.hbm [shape: f32[1,448], index: 7, kind: input, shape index: {}]   ;;  %s2788_s8 = inlined_call_operand.vmem [shape: bf16[128,128], index: 8, kind: input, shape index: {}]   ;;  %s2789_s9 = inlined_call_operand.vmem [shape: f32[1,128], index: 9, kind: input, shape index: {}]   ;;  %s2790_s10 = inlined_call_operand.vmem [shape: bf16[128,512], index: 10, kind: input, shape index: {}]   ;;  %s2791_s11 = inlined_call_operand.vmem [shape: bf16[256,128], index: 11, kind: input, shape index: {}]   ;;  %s2792_s12 = inlined_call_operand.hbm [shape: f32[16,128], index: 12, kind: output, shape index: {}]  }
   0x1   :  { %2793 = sst [smem:[#allocation9_spill]] %s2787_s7 }
   0x2   :  { %17 = vsyncpa [#allocation3], 0 }
   0x3   :  { %18 = vsyncpa [#allocation4], 0 }
   0x4   :  { %20 = vsyncpa [#allocation4 + $0x1], 0  ;;  %s2310_s21 = smov 0   ;;  %s2312_s22 = smov 0  }
   0x5   :  { %s2314_s23 = smov 0   ;;  %s2316_s24 = smov 0  }
   0x6 LB: > { %s2331_s25 = sadd.s32 4294967295, %s2234_s24   ;;  %s1741_s26 = sadd.s32 4294967294, %s2234_s24   ;;  %s2234_s24 = sphi %s2316_s24, %s2804_s24   ;;  %s2230_s23 = sphi %s2314_s23, %s2803_s23   ;;  %s2226_s22 = sphi %s2312_s22, %s2802_s22   ;;  %s2222_s21 = sphi %s2310_s21, %s2801_s21  }
   0x7   : > { %s2335_s27 = sadd.s32 1, %s2234_s24   ;;  %s290_s28 = sadd.s32 1, %s2230_s23 }
   0x8   : > { %s287_s29 = ssub.s32 %s2234_s24, %s2335_s27  ;;  %p300_p0 = scmp.ne.s32.totalorder %s2230_s23, %s2226_s22 }
   0x9   : > { %p288_p1 = scmp.eq.s32.totalorder %s287_s29, 0  ;;  %p301_p2 = scmp.eq.s32.totalorder %s2331_s25, 1 }
   0xa   : > { %p306_p3 = scmp.ne.s32.totalorder %s2226_s22, %s2222_s21  ;;  %p307_p4 = scmp.eq.s32.totalorder %s1741_s26, 1 }
   0xb   : > { %s2346_s30 = scalar_select %p288_p1, %s2230_s23, %s290_s28  }
   0xc   : > { %p2348_p5 = por %p301_p2, %p300_p0  ;;  %p2352_p6 = por %p307_p4, %p306_p3 }
   0xd   : > { %2794 = sst [smem:[#allocation8_spill]] %s2346_s30  ;;  %p1742_p7 = scmp.ge.s32.totalorder %s2234_s24, 1 }
   0xe   : > { %s2796_s14 = scalar_select %p2352_p6, 1, 0 }
   0xf   : > { %p314_p8 = scmp.lt.s32.totalorder %s2234_s24, 3  ;;  %p1953_p9 = scmp.eq.s32.totalorder %s2331_s25, 0 }
  0x10   : > { %s2236_s16 = smov [#allocation2]  }
  0x11   : > { %p2359_p10 = pnand %p1742_p7, %p314_p8  ;;  %s345_s17 = sshll.u32 %s2236_s16, 4  ;;  %s346_s17 = int_to_ptr.vmem [resolvable:$true] %s345_s17 }
  0x12   : > { %s2155_s18 = scalar_lea.vmem %s346_s17, 64  ;;  %p2163_p3 = scmp.lt.s32.totalorder %s346_s17, %s346_s17 }
  0x13   : > { %p1945_p11 = pneg %p2359_p10  ;;  %p2156_p0 = scmp.ne.s32.totalorder %s346_s17, %s2155_s18 }
  0x14   : > { %p2164_p4 = scmp.lt.s32.totalorder %s2155_s18, %s2155_s18 }
  0x15   : > { %p1946_p12 = pnand %p1953_p9, %p1945_p11 }
  0x16   : > { %p2165_p6 = por %p2164_p4, %p2163_p3 }
  0x17   : > { %p2146_p13 = pneg %p1946_p12 }
  0x19   : > { %p2158_p1 = pnand %p2156_p0, %p2146_p13 }
  0x1b   : > { %p2159_p2 = pneg %p2158_p1 }
  0x1d   : > { %p2166_p7 = pnand %p2165_p6, %p2159_p2 }
  0x1f   : > { %2169 = shalt.err (!%p2166_p7)
}
  0x20   : > { %s2798_s7 = sld [smem:[#allocation9_spill]] }
  0x22   : > { %377 = sbr.rel (%p2359_p10) target bundleno = 2301 (0x8fd), region = 68 }
  0x26   : > { %1948 = dma.hbm_to_vmem [thread:$0]  (!%p1946_p12), %s2798_s7, 64, %s346_s17, [#allocation3]  }
  0x27   : > { %2213 = dma.done.wait (%p1953_p9), [#allocation3], 64  }
  0x28   : > { %2215 = vsyncadd (%p1953_p9), [#allocation3], 4294967232  ;;  %p418_p8 = scmp.lt.s32.totalorder %s2331_s25, 1  ;;  %v1996_v2 = vld [vmem:[%s2786_s6 + $0xe4] ss:$16 sps:$4 sm:$0xff]   ;;  %v2237_v30 = vmov 0   ;;  %v475_v45 = vlaneseq }
  0x29   : > { %v1998_v3 = vld [vmem:[%s2786_s6 + $0xec] ss:$16 sps:$4 sm:$0xff]   ;;  %v2000_v4 = vld [vmem:[%s2786_s6 + $0xe0] ss:$16 sps:$4 sm:$0xff]   ;;  %v2001_v5 = vld [vmem:[%s2786_s6 + $0xe8] ss:$16 sps:$4 sm:$0xff]   ;;  %655 = vmatprep.subr.bf16.mxu0 %v1996_v2  ;;  %687 = vmatprep.mubr.bf16.mxu0 %v2237_v30 }
  0x2a   : > { %s419_s26 = scalar_select %p418_p8, %s2331_s25, 1  ;;  %v2002_v6 = vld [vmem:[%s2786_s6 + $0xc4] ss:$16 sps:$4 sm:$0xff]   ;;  %696 = vmatprep.subr.bf16.mxu1 %v1998_v3  ;;  %656 = vmatpush1.bf16.msra.mxu0 %v2000_v4  ;;  %v2004_v7 = vld [vmem:[%s2786_s6 + $0xcc] ss:$16 sps:$4 sm:$0xff]   ;;  %v2239_v44 = vmov 0.0  }
  0x2b   : > { %697 = vmatpush1.bf16.msra.mxu1 %v2001_v5  ;;  %657 = vmatprep.subr.bf16.mxu0 %v2002_v6  ;;  %v2006_v8 = vld [vmem:[%s2786_s6 + $0xc0] ss:$16 sps:$4 sm:$0xff]   ;;  %v2007_v9 = vld [vmem:[%s2786_s6 + $0xc8] ss:$16 sps:$4 sm:$0xff]   ;;  %v2008_v10 = vld [vmem:[%s2786_s6 + $0xa4] ss:$16 sps:$4 sm:$0xff]  }
  0x2c   : > { %s1748_s28 = sshll.u32 %s419_s26, 3  ;;  %698 = vmatprep.subr.bf16.mxu1 %v2004_v7  ;;  %v2010_v11 = vld [vmem:[%s2786_s6 + $0xac] ss:$16 sps:$4 sm:$0xff]   ;;  %v2012_v12 = vld [vmem:[%s2786_s6 + $0xa0] ss:$16 sps:$4 sm:$0xff]   ;;  %728 = vmatprep.mubr.bf16.mxu1 %v2237_v30  ;;  %s2238_s15 = smov 64  }
  0x2d   : > { %s421_s18 = scalar_lea.vmem %s2780_s0, %s1748_s28  ;;  %v2013_v13 = vld [vmem:[%s2786_s6 + $0xa8] ss:$16 sps:$4 sm:$0xff]   ;;  %v2014_v14 = vld [vmem:[%s2786_s6 + $0x84] ss:$16 sps:$4 sm:$0xff]   ;;  %v2016_v15 = vld [vmem:[%s2786_s6 + $0x8c] ss:$16 sps:$4 sm:$0xff]  }
  0x2e   : > { %v2381_v0 = vld [vmem:[%s421_s18] sm:$0xff]  ;;  %658 = vmatpush1.bf16.msra.mxu0 %v2006_v8  ;;  %v2019_v17 = vld [vmem:[%s2786_s6 + $0x88] ss:$16 sps:$4 sm:$0xff]   ;;  %v2022_v19 = vld [vmem:[%s2786_s6 + $0x6c] ss:$16 sps:$4 sm:$0xff]   ;;  %v2493_v46 = vshrl.u32 %v475_v45, 7 }
  0x2f   : > { %v425_v1 = vmul.f32 %v2381_v0, %v2381_v0  ;;  %699 = vmatpush1.bf16.msra.mxu1 %v2007_v9  ;;  %659 = vmatprep.subr.bf16.mxu0 %v2008_v10  ;;  %v2018_v16 = vld [vmem:[%s2786_s6 + $0x80] ss:$16 sps:$4 sm:$0xff]   ;;  %v2020_v18 = vld [vmem:[%s2786_s6 + $0x64] ss:$16 sps:$4 sm:$0xff]   ;;  %v2025_v21 = vld [vmem:[%s2786_s6 + $0x68] ss:$16 sps:$4 sm:$0xff]  }
  0x30   : > { %700 = vmatprep.subr.bf16.mxu1 %v2010_v11  ;;  %v2024_v20 = vld [vmem:[%s2786_s6 + $0x60] ss:$16 sps:$4 sm:$0xff]   ;;  %v2026_v22 = vld [vmem:[%s2786_s6 + $0x44] ss:$16 sps:$4 sm:$0xff]   ;;  %v2028_v23 = vld [vmem:[%s2786_s6 + $0x4c] ss:$16 sps:$4 sm:$0xff]  }
  0x31   : > { %426 = vadd.xlane.f32.xlu0 %v425_v1  ;;  %v2030_v24 = vld [vmem:[%s2786_s6 + $0x40] ss:$16 sps:$4 sm:$0xff]   ;;  %v2031_v25 = vld [vmem:[%s2786_s6 + $0x48] ss:$16 sps:$4 sm:$0xff]   ;;  %v2032_v26 = vld [vmem:[%s2786_s6 + $0x24] ss:$16 sps:$4 sm:$0xff]  }
  0x32   : > { %660 = vmatpush1.bf16.msra.mxu0 %v2012_v12  ;;  %v2034_v27 = vld [vmem:[%s2786_s6 + $0x2c] ss:$16 sps:$4 sm:$0xff]   ;;  %v2036_v28 = vld [vmem:[%s2786_s6 + $0x20] ss:$16 sps:$4 sm:$0xff]   ;;  %v2037_v29 = vld [vmem:[%s2786_s6 + $0x28] ss:$16 sps:$4 sm:$0xff]  }
  0x33   : > { %701 = vmatpush1.bf16.msra.mxu1 %v2013_v13  ;;  %661 = vmatprep.subr.bf16.mxu0 %v2014_v14  ;;  %v2038_v31 = vld [vmem:[%s2786_s6 + $0x4] ss:$16 sps:$4 sm:$0xff]   ;;  %v2040_v32 = vld [vmem:[%s2786_s6 + $0xc] ss:$16 sps:$4 sm:$0xff]   ;;  %v2042_v33 = vld [vmem:[%s2786_s6] ss:$16 sps:$4 sm:$0xff]  }
  0x34   : > { %702 = vmatprep.subr.bf16.mxu1 %v2016_v15  ;;  %v2043_v34 = vld [vmem:[%s2786_s6 + $0x8] ss:$16 sps:$4 sm:$0xff]   ;;  %v744_v35 = vld [vmem:[%s2784_s4] sm:$0xff]  ;;  %v477_v47 = vsub.s32 0, %v2493_v46  ;;  %v485_v48 = vsub.s32 2, %v2493_v46  ;;  %v481_v50 = vsub.s32 1, %v2493_v46 }
  0x35   : > { %v1749_v40 = vld [vmem:[%s2785_s5] ss:$0 sm:$0xff]  ;;  %v489_v51 = vsub.s32 3, %v2493_v46  ;;  %vm2240_vm0 = vmmov 0   ;;  %vm859_vm1 = vcmask 1043456   ;;  %s2241_s29 = smov 96  }
  0x36   : > { %662 = vmatpush1.bf16.msra.mxu0 %v2018_v16  ;;  %v473_v49 = vld [vmem:[#allocation2] sm:$0xf]  ;;  %vm784_vm2 = vcmask 261120   ;;  %vm832_vm4 = vcmask 64512   ;;  %vm1066_vm5 = vcmask 523264   ;;  %s415_s19 = sand.u32 1, %s2226_s22  }
  0x37   : > { %703 = vmatpush1.bf16.msra.mxu1 %v2019_v17  ;;  %663 = vmatprep.subr.bf16.mxu0 %v2020_v18  ;;  %v478_v52 = vrot.slane %v473_v49, %v477_v47  ;;  %v486_v53 = vrot.slane %v473_v49, %v485_v48  ;;  %v482_v54 = vrot.slane %v473_v49, %v481_v50  ;;  %v737_v61 = vld [vmem:[%s2781_s1] sm:$0xff]  ;;  %s1747_s20 = sshll.u32 %s415_s19, 3  ;;  %s1848_s26 = sshll.u32 %s2331_s25, 7 }
  0x38   : > { %704 = vmatprep.subr.bf16.mxu1 %v2022_v19  ;;  %v490_v55 = vrot.slane %v473_v49, %v489_v51  ;;  %v739_v63 = vld [vmem:[%s2782_s2] sm:$0xff]  ;;  %s1657_s7 = scalar_lea.sflag [#allocation4], %s415_s19  ;;  %s2244_s25 = smov [#allocation5]  }
  0x39   : > { %v742_v14 = vld [vmem:[%s2783_s3] sm:$0xff]  ;;  %s2174_s17 = sshll.u32 %s2244_s25, 4  ;;  %s2175_s17 = int_to_ptr.vmem [resolvable:$false] %s2174_s17 }
  0x3a   : > { %664 = vmatpush1.bf16.msra.mxu0 %v2024_v20 }
  0x3b   : > { %705 = vmatpush1.bf16.msra.mxu1 %v2025_v21  ;;  %665 = vmatprep.subr.bf16.mxu0 %v2026_v22 }
  0x3c   : > { %706 = vmatprep.subr.bf16.mxu1 %v2028_v23 }
  0x3e   : > { %666 = vmatpush1.bf16.msra.mxu0 %v2030_v24 }
  0x3f   : > { %707 = vmatpush1.bf16.msra.mxu1 %v2031_v25  ;;  %667 = vmatprep.subr.bf16.mxu0 %v2032_v26  ;;  %v758_v25 = vand.u32 127, %v475_v45  ;;  %v2242_v26 = vmov -1e+30  }
  0x40   : > { %708 = vmatprep.subr.bf16.mxu1 %v2034_v27 }
  0x41   : > { %vm759_vm3 = vcmp.ge.s32.totalorder %v2493_v46, %v758_v25 }
  0x42   : > { %668 = vmatpush1.bf16.msra.mxu0 %v2036_v28  ;;  %v760_v27 = vsel %vm759_vm3, 0.0, %v2242_v26  ;;  %v2047_v26 = vld [vmem:[%s2788_s8 + $0x20] sm:$0xff]  }
  0x43   : > { %709 = vmatpush1.bf16.msra.mxu1 %v2037_v29  ;;  %669 = vmatprep.subr.bf16.mxu0 %v2038_v31 }
  0x44   : > { %710 = vmatprep.subr.bf16.mxu1 %v2040_v32 }
  0x46   : > { %670 = vmatpush1.bf16.msra.mxu0 %v2042_v33 }
  0x47   : > { %711 = vmatpush1.bf16.msra.mxu1 %v2043_v34  ;;  %746 = vrot.lane.b32.xlu0 %v744_v35, %s2238_s15 }
  0x48   : > { %1897 = vmatprep.subr.bf16.mxu1 %v2239_v44  ;;  %1891 = vmatprep.subr.bf16.mxu0 %v2239_v44 }
  0xba   : > { %v427_v36 = vpop.xlane.xlu0 %426 }
  0xbb   : > { %v429_v37 = vmul.f32 0.0078125, %v427_v36 }
  0xbd   : > { %v430_v38 = vadd.f32 1e-06, %v429_v37 }
  0xbe   : > { %v747_v56 = vpop.permute.xlu0 %746 }
  0xbf   : > { %2116 = vrsqrt.f32 %v430_v38 }
  0xcc   : > { %v2117_v39 = vpop.eup %2116 }
  0xcd   : > { %v432_v41 = vmul.f32 %v2117_v39, %v2381_v0 }
  0xcf   : > { %v439_v42 = vmul.f32 %v1749_v40, %v432_v41 }
  0xd1   : > { %v440_v43 = vpack.c.bf16 %v439_v42, %v439_v42 }
  0xd3   : > { %688 = vmatmul.mubr.bf16.vlgmr.msra.gmra.mxu0 %v440_v43  ;;  %729 = vmatmul.mubr.bf16.vlgmr.msra.gmra.mxu1 %v440_v43 }
  0xd4   : > { %1893 = vmatprep.mubr.msk.bf16.mxu0 %vm2240_vm0, %v2239_v44  ;;  %1899 = vmatprep.mubr.msk.bf16.mxu1 %vm2240_vm0, %v2239_v44 }
 0x193   : > { %v689_v57 = vpop.f32.mrf.mxu0  ;;  %v730_v58 = vpop.f32.mrf.mxu1 }
 0x194   : > { %v690_v59 = vadd.f32 %v689_v57, %v478_v52  ;;  %v731_v60 = vadd.f32 %v730_v58, %v486_v53 }
 0x195   : > { %v691_v62 = vpop.f32.mrf.mxu0  ;;  %v732_v1 = vpop.f32.mrf.mxu1 }
 0x196   : > { %v692_v2 = vadd.f32 %v691_v62, %v482_v54  ;;  %v733_v3 = vadd.f32 %v732_v1, %v490_v55  ;;  %v749_v4 = vmul.f32 %v747_v56, %v731_v60  ;;  %v738_v7 = vmul.f32 %v737_v61, %v690_v59 }
 0x197   : > { %v693_v5 = vpop.f32.mrf.mxu0  ;;  %v734_v6 = vpop.f32.mrf.mxu1  ;;  %v743_v15 = vmul.f32 %v742_v14, %v731_v60 }
 0x198   : > { %v740_v8 = vmul.f32 %v739_v63, %v692_v2  ;;  %v2509_v9 = vpack.c.bf16 %v733_v3, %v733_v3  ;;  %751 = vrot.lane.b32.xlu1 %v749_v4, %s2238_s15 }
 0x199   : > { %v694_v10 = vpop.f32.mrf.mxu0  ;;  %v735_v11 = vpop.f32.mrf.mxu1 }
 0x19a   : > { %v861_v12 = vsel %vm859_vm1, %v2509_v9, 0  ;;  %v741_v13 = vadd.f32 %v740_v8, %v738_v7 }
 0x19b   : > { %1898 = vmatpush3.bf16.msra.mxu1 %v861_v12 }
 0x19c   : > { %778 = vrot.lane.b32.xlu1 %v741_v13, %s2241_s29  ;;  %1909 = vmatprep.subr.bf16.mxu1 %v2239_v44 }
 0x20a   : > { %v752_v16 = vpop.permute.xlu1 %751 }
 0x20b   : > { %v754_v17 = vadd.f32 %v752_v16, %v743_v15 }
 0x20d   : > { %v782_v18 = vpack.c.bf16 %v754_v17, %v754_v17 }
 0x20e   : > { %v779_v19 = vpop.permute.xlu1 %778 }
 0x20f   : > { %v789_v20 = vsel %vm784_vm2, %v782_v18, 0  ;;  %914 = vrot.lane.b32.xlu1 %v782_v18, %s2241_s29  ;;  %v781_v21 = vpack.c.bf16 %v779_v19, %v741_v13  ;;  %v2044_v19 = vld [vmem:[%s2788_s8 + $0x38] sm:$0xff]  }
 0x210   : > { %1892 = vmatpush3.bf16.xpose.msra.mxu0 %v789_v20  ;;  %v2045_v20 = vld [vmem:[%s2788_s8 + $0x30] sm:$0xff]  }
 0x211   : > { %1903 = vmatprep.subr.bf16.mxu0 %v2239_v44 }
 0x213   : > { %911 = vrot.lane.b32.xlu1 %v781_v21, %s2238_s15  ;;  %s2745_s15 = scalar_lea.hbm %s2792_s12, %s1848_s26 }
 0x217   : > { %1894 = vmatmul.mubr.msk.bf16.vlgmr.msra.gmra.mxu0 %vm784_vm2, %v781_v21 }
 0x218   : > { %1905 = vmatprep.mubr.msk.bf16.mxu0 %vm2240_vm0, %v2239_v44 }
 0x281   : > { %v915_v22 = vpop.permute.xlu1 %914 }
 0x282   : > { %v920_v23 = vsel %vm784_vm2, %v915_v22, 0 }
 0x283   : > { %1904 = vmatpush3.bf16.xpose.msra.mxu0 %v920_v23  ;;  %v2046_v23 = vld [vmem:[%s2788_s8 + $0x28] sm:$0xff]  }
 0x285   : > { %v912_v24 = vpop.permute.xlu1 %911 }
 0x28a   : > { %1906 = vmatmul.mubr.msk.bf16.vlgmr.msra.gmra.mxu0 %vm784_vm2, %v912_v24 }
 0x28b   : > { %1418 = vmatprep.mubr.bf16.mxu0 %v2237_v30 }
 0x2d7   : > { %v825_v28 = vpop.f32.mrf.mxu0 }
 0x2d8   : > { %v826_v29 = vadd.f32 %v825_v28, %v760_v27 }
 0x2d9   : > { %v1895_v31 = vpop.f32.mrf.mxu0 }
 0x2da   : > { %v833_v32 = vsel %vm832_vm4, %v826_v29, -inf }
 0x2db   : > { %834 = vmax.xlane.f32.xlu1 %v833_v32  ;;  %v828_v33 = vpop.f32.mrf.mxu0 }
 0x2dc   : > { %v829_v34 = vadd.f32 %v828_v33, %v760_v27 }
 0x2dd   : > { %v1896_v35 = vpop.f32.mrf.mxu0 }
 0x2de   : > { %v836_v36 = vsel %vm832_vm4, %v829_v34, -inf }
 0x2df   : > { %837 = vmax.xlane.f32.xlu0 %v836_v36  ;;  %v2049_v36 = vld [vmem:[%s2788_s8 + $0x10] sm:$0xff]  }
 0x34a   : > { %v956_v37 = vpop.f32.mrf.mxu0 }
 0x34b   : > { %v957_v38 = vadd.f32 %v956_v37, %v760_v27  ;;  %v2050_v37 = vld [vmem:[%s2788_s8 + $0x8] sm:$0xff]  }
 0x34c   : > { %v1907_v39 = vpop.f32.mrf.mxu0 }
 0x34d   : > { %v963_v40 = vsel %vm832_vm4, %v957_v38, -inf  ;;  %v2051_v39 = vld [vmem:[%s2788_s8] sm:$0xff]  }
 0x34e   : > { %964 = vmax.xlane.f32.xlu1 %v963_v40  ;;  %v959_v41 = vpop.f32.mrf.mxu0 }
 0x34f   : > { %v960_v42 = vadd.f32 %v959_v41, %v760_v27 }
 0x350   : > { %v1908_v43 = vpop.f32.mrf.mxu0 }
 0x351   : > { %v966_v45 = vsel %vm832_vm4, %v960_v42, -inf  ;;  %v2054_v43 = vld [vmem:[%s2790_s10 + $0xe4] ss:$16 sps:$4 sm:$0xff]  }
 0x352   : > { %967 = vmax.xlane.f32.xlu1 %v966_v45  ;;  %v2057_v45 = vld [vmem:[%s2790_s10 + $0xec] ss:$16 sps:$4 sm:$0xff]   ;;  %1386 = vmatprep.subr.bf16.mxu0 %v2054_v43  ;;  %v2114_v43 = vld [vmem:[%s2791_s11 + $0x40] sm:$0xff]  }
 0x364   : > { %v835_v46 = vpop.xlane.xlu1 %834 }
 0x365   : > { %v839_v47 = vsub.f32 %v826_v29, %v835_v46  ;;  %v2063_v46 = vld [vmem:[%s2790_s10 + $0xcc] ss:$16 sps:$4 sm:$0xff]  }
 0x367   : > { %v841_v48 = vmul.f32 1.442695, %v839_v47  ;;  %v2058_v47 = vld [vmem:[%s2790_s10 + $0xc0] ss:$16 sps:$4 sm:$0xff]  }
 0x368   : > { %v838_v49 = vpop.xlane.xlu0 %837 }
 0x369   : > { %2118 = vpow2.f32 %v841_v48  ;;  %v840_v50 = vsub.f32 %v829_v34, %v838_v49  ;;  %v2048_v34 = vld [vmem:[%s2788_s8 + $0x18] sm:$0xff]  }
 0x36a   : > { %v2061_v48 = vld [vmem:[%s2790_s10 + $0xc8] ss:$16 sps:$4 sm:$0xff]  }
 0x36b   : > { %v843_v51 = vmul.f32 1.442695, %v840_v50 }
 0x36d   : > { %2120 = vpow2.f32 %v843_v51 }
 0x376   : > { %v2119_v52 = vpop.eup %2118 }
 0x377   : > { %v845_v53 = vsel %vm832_vm4, %v2119_v52, 0.0 }
 0x378   : > { %846 = vadd.xlane.f32.xlu0 %v845_v53 }
 0x37a   : > { %v2121_v54 = vpop.eup %2120 }
 0x37b   : > { %v848_v55 = vsel %vm832_vm4, %v2121_v54, 0.0 }
 0x37c   : > { %849 = vadd.xlane.f32.xlu1 %v848_v55 }
 0x3d7   : > { %v965_v56 = vpop.xlane.xlu1 %964 }
 0x3d8   : > { %v969_v57 = vsub.f32 %v957_v38, %v965_v56 }
 0x3da   : > { %v971_v58 = vmul.f32 1.442695, %v969_v57 }
 0x3db   : > { %v968_v59 = vpop.xlane.xlu1 %967 }
 0x3dc   : > { %2122 = vpow2.f32 %v971_v58  ;;  %v970_v60 = vsub.f32 %v960_v42, %v968_v59  ;;  %v2052_v42 = vld [vmem:[%s2790_s10 + $0xe0] ss:$16 sps:$4 sm:$0xff]  }
 0x3dd   : > { %1387 = vmatpush1.bf16.msra.mxu0 %v2052_v42  ;;  %v2113_v42 = vld [vmem:[%s2791_s11 + $0x8] sm:$0xff]  }
 0x3de   : > { %v973_v61 = vmul.f32 1.442695, %v970_v60  ;;  %v2066_v60 = vld [vmem:[%s2790_s10 + $0xa4] ss:$16 sps:$4 sm:$0xff]  }
 0x3e0   : > { %2124 = vpow2.f32 %v973_v61  ;;  %v2069_v61 = vld [vmem:[%s2790_s10 + $0xac] ss:$16 sps:$4 sm:$0xff]  }
 0x3e9   : > { %v2123_v62 = vpop.eup %2122 }
 0x3ea   : > { %v975_v63 = vsel %vm832_vm4, %v2123_v62, 0.0 }
 0x3eb   : > { %976 = vadd.xlane.f32.xlu0 %v975_v63  ;;  %v2072_v63 = vld [vmem:[%s2790_s10 + $0x84] ss:$16 sps:$4 sm:$0xff]  }
 0x3ed   : > { %v2125_v1 = vpop.eup %2124 }
 0x3ee   : > { %v978_v2 = vsel %vm832_vm4, %v2125_v1, 0.0 }
 0x3ef   : > { %979 = vadd.xlane.f32.xlu1 %v978_v2  ;;  %v2070_v2 = vld [vmem:[%s2790_s10 + $0x80] ss:$16 sps:$4 sm:$0xff]  }
 0x401   : > { %v847_v3 = vpop.xlane.xlu0 %846  ;;  %987 = vrot.lane.b32.xlu0 %v2509_v9, %s2241_s29  ;;  %s2243_s29 = smov 32  }
 0x402   : > { %2126 = vrcp.f32 %v847_v3  ;;  %v2073_v3 = vld [vmem:[%s2790_s10 + $0x88] ss:$16 sps:$4 sm:$0xff]  }
 0x405   : > { %v850_v4 = vpop.xlane.xlu1 %849 }
 0x406   : > { %2128 = vrcp.f32 %v850_v4  ;;  %v2078_v4 = vld [vmem:[%s2790_s10 + $0x64] ss:$16 sps:$4 sm:$0xff]  }
 0x40f   : > { %v2127_v5 = vpop.eup %2126 }
 0x410   : > { %v853_v7 = vmul.f32 %v2127_v5, %v2119_v52  ;;  %v2076_v5 = vld [vmem:[%s2790_s10 + $0x60] ss:$16 sps:$4 sm:$0xff]  }
 0x413   : > { %v2129_v6 = vpop.eup %2128 }
 0x414   : > { %v854_v8 = vmul.f32 %v2129_v6, %v2121_v54  ;;  %v2079_v6 = vld [vmem:[%s2790_s10 + $0x68] ss:$16 sps:$4 sm:$0xff]  }
 0x416   : > { %v855_v10 = vpack.c.bf16 %v854_v8, %v853_v7  ;;  %v2081_v7 = vld [vmem:[%s2790_s10 + $0x6c] ss:$16 sps:$4 sm:$0xff]   ;;  %v2084_v8 = vld [vmem:[%s2790_s10 + $0x44] ss:$16 sps:$4 sm:$0xff]  }
 0x418   : > { %1900 = vmatmul.mubr.msk.bf16.vlgmr.msra.gmra.mxu1 %vm832_vm4, %v855_v10  ;;  %v2087_v10 = vld [vmem:[%s2790_s10 + $0x4c] ss:$16 sps:$4 sm:$0xff]  }
 0x419   : > { %1911 = vmatprep.mubr.msk.bf16.mxu1 %vm2240_vm0, %v2239_v44 }
 0x474   : > { %v977_v11 = vpop.xlane.xlu0 %976 }
 0x475   : > { %2130 = vrcp.f32 %v977_v11  ;;  %v2082_v11 = vld [vmem:[%s2790_s10 + $0x40] ss:$16 sps:$4 sm:$0xff]  }
 0x478   : > { %v988_v12 = vpop.permute.xlu0 %987  ;;  %v980_v13 = vpop.xlane.xlu1 %979 }
 0x479   : > { %v993_v14 = vsel %vm859_vm1, %v988_v12, 0  ;;  %2132 = vrcp.f32 %v980_v13  ;;  %v2085_v12 = vld [vmem:[%s2790_s10 + $0x48] ss:$16 sps:$4 sm:$0xff]   ;;  %v2090_v13 = vld [vmem:[%s2790_s10 + $0x24] ss:$16 sps:$4 sm:$0xff]  }
 0x47a   : > { %1910 = vmatpush3.bf16.msra.mxu1 %v993_v14  ;;  %v2093_v14 = vld [vmem:[%s2790_s10 + $0x2c] ss:$16 sps:$4 sm:$0xff]  }
 0x47b   : > { %1915 = vmatprep.subr.bf16.mxu1 %v2239_v44 }
 0x482   : > { %v2131_v9 = vpop.eup %2130 }
 0x483   : > { %v983_v16 = vmul.f32 %v2131_v9, %v2123_v62  ;;  %v2064_v62 = vld [vmem:[%s2790_s10 + $0xa0] ss:$16 sps:$4 sm:$0xff]  }
 0x484   : > { %v2088_v9 = vld [vmem:[%s2790_s10 + $0x20] ss:$16 sps:$4 sm:$0xff]  }
 0x486   : > { %v2133_v15 = vpop.eup %2132 }
 0x487   : > { %v984_v17 = vmul.f32 %v2133_v15, %v2125_v1  ;;  %v2075_v1 = vld [vmem:[%s2790_s10 + $0x8c] ss:$16 sps:$4 sm:$0xff]   ;;  %v2091_v15 = vld [vmem:[%s2790_s10 + $0x28] ss:$16 sps:$4 sm:$0xff]  }
 0x489   : > { %v985_v18 = vpack.c.bf16 %v984_v17, %v983_v16  ;;  %v2096_v16 = vld [vmem:[%s2790_s10 + $0x4] ss:$16 sps:$4 sm:$0xff]   ;;  %v2099_v17 = vld [vmem:[%s2790_s10 + $0xc] ss:$16 sps:$4 sm:$0xff]  }
 0x48b   : > { %1912 = vmatmul.mubr.msk.bf16.vlgmr.msra.gmra.mxu1 %vm832_vm4, %v985_v18  ;;  %v2094_v18 = vld [vmem:[%s2790_s10] ss:$16 sps:$4 sm:$0xff]  }
 0x48c   : > { %1923 = vmatprep.mubr.msk.bf16.mxu1 %vm2240_vm0, %v2239_v44  ;;  %1916 = vmatpush3.bf16.msra.mxu1 %v2044_v19  ;;  %v2097_v19 = vld [vmem:[%s2790_s10 + $0x8] ss:$16 sps:$4 sm:$0xff]  }
 0x48d   : > { %1917 = vmatprep.subr.bf16.mxu1 %v2239_v44 }
 0x490   : > { %1918 = vmatpush3.bf16.msra.mxu1 %v2045_v20 }
 0x491   : > { %1919 = vmatprep.subr.bf16.mxu1 %v2239_v44 }
 0x494   : > { %1920 = vmatpush3.bf16.msra.mxu1 %v2046_v23 }
 0x495   : > { %1921 = vmatprep.subr.bf16.mxu1 %v2239_v44 }
 0x498   : > { %1922 = vmatpush3.bf16.msra.mxu1 %v2047_v26 }
 0x499   : > { %1927 = vmatprep.subr.bf16.mxu1 %v2239_v44 }
 0x4d8   : > { %v897_v21 = vpop.f32.mrf.mxu1 }
 0x4da   : > { %v1901_v22 = vpop.f32.mrf.mxu1 }
 0x4dc   : > { %v900_v24 = vpop.f32.mrf.mxu1 }
 0x4de   : > { %v1902_v25 = vpop.f32.mrf.mxu1 }
 0x54b   : > { %v1029_v27 = vpop.f32.mrf.mxu1 }
 0x54d   : > { %v1913_v28 = vpop.f32.mrf.mxu1 }
 0x54e   : > { %v2100_v28 = vld [vmem:[%s2791_s11 + $0x78] sm:$0xff]  }
 0x54f   : > { %v1032_v29 = vpop.f32.mrf.mxu1 }
 0x550   : > { %1037 = vrot.lane.b32.xlu1 %v1032_v29, %s2243_s29  ;;  %v2101_v29 = vld [vmem:[%s2791_s11 + $0x38] sm:$0xff]  }
 0x551   : > { %v1914_v31 = vpop.f32.mrf.mxu1 }
 0x552   : > { %v2102_v31 = vld [vmem:[%s2791_s11 + $0x70] sm:$0xff]  }
 0x554   : > { %905 = vrot.lane.b32.xlu1 %v900_v24, %s2243_s29  ;;  %v1796_v24 = vld [vmem:[%s2789_s9] ss:$0 sm:$0xff]  ;;  %s417_s29 = scalar_lea.vmem [#allocation5], %s1747_s20  ;;  %s2176_s20 = scalar_lea.vmem %s2175_s17, 256 }
 0x555   : > { %s1670_s28 = sshll.u32 %s417_s29, 4  ;;  %s1671_s28 = int_to_ptr.vmem [resolvable:$true] %s1670_s28 }
 0x556   : > { %s2170_s30 = scalar_lea.vmem %s1671_s28, 128  ;;  %p2177_p11 = scmp.lt.s32.totalorder %s1671_s28, %s2175_s17 }
 0x557   : > { %p2171_p6 = scmp.ne.s32.totalorder %s1671_s28, %s2170_s30  ;;  %p2178_p12 = scmp.lt.s32.totalorder %s2176_s20, %s2170_s30 }
 0x559   : > { %p2172_p9 = pnand %p2171_p6, %p2348_p5  ;;  %p2179_p13 = por %p2178_p12, %p2177_p11 }
 0x55b   : > { %p2173_p10 = pneg %p2172_p9 }
 0x55d   : > { %p2180_p0 = pnand %p2179_p13, %p2173_p10 }
 0x5c2   : > { %v1038_v32 = vpop.permute.xlu1 %1037 }
 0x5c3   : > { %v1040_v33 = vsel %vm784_vm2, %v1029_v27, %v1038_v32  ;;  %v2103_v32 = vld [vmem:[%s2791_s11 + $0x30] sm:$0xff]  }
 0x5c4   : > { %v1041_v35 = vpack.c.bf16 %v1040_v33, %v1040_v33  ;;  %v2104_v33 = vld [vmem:[%s2791_s11 + $0x68] sm:$0xff]  }
 0x5c6   : > { %1924 = vmatmul.mubr.msk.bf16.vlgmr.msra.gmra.mxu1 %vm1066_vm5, %v1041_v35  ;;  %v906_v38 = vpop.permute.xlu1 %905  ;;  %v2106_v35 = vld [vmem:[%s2791_s11 + $0x60] sm:$0xff]  }
 0x5c7   : > { %1928 = vmatpush3.bf16.msra.mxu1 %v2048_v34  ;;  %1935 = vmatprep.mubr.msk.bf16.mxu1 %vm2240_vm0, %v2239_v44  ;;  %v908_v40 = vsel %vm784_vm2, %v897_v21, %v906_v38  ;;  %v2105_v34 = vld [vmem:[%s2791_s11 + $0x28] sm:$0xff]   ;;  %v2109_v38 = vld [vmem:[%s2791_s11 + $0x18] sm:$0xff]  }
 0x5c8   : > { %1929 = vmatprep.subr.bf16.mxu1 %v2239_v44  ;;  %v909_v41 = vpack.c.bf16 %v908_v40, %v908_v40  ;;  %v2111_v40 = vld [vmem:[%s2791_s11 + $0x10] sm:$0xff]  }
 0x5cb   : > { %1930 = vmatpush3.bf16.msra.mxu1 %v2049_v36  ;;  %v2107_v36 = vld [vmem:[%s2791_s11 + $0x20] sm:$0xff]  }
 0x5cc   : > { %1931 = vmatprep.subr.bf16.mxu1 %v2239_v44 }
 0x5cf   : > { %1932 = vmatpush3.bf16.msra.mxu1 %v2050_v37  ;;  %v2108_v37 = vld [vmem:[%s2791_s11 + $0x58] sm:$0xff]  }
 0x5d0   : > { %1933 = vmatprep.subr.bf16.mxu1 %v2239_v44  ;;  %v2055_v44 = vld [vmem:[%s2790_s10 + $0xe8] ss:$16 sps:$4 sm:$0xff]  }
 0x5d3   : > { %1934 = vmatpush3.bf16.msra.mxu1 %v2051_v39  ;;  %v2110_v39 = vld [vmem:[%s2791_s11 + $0x50] sm:$0xff]  }
 0x5d4   : > { %1427 = vmatprep.subr.bf16.mxu1 %v2057_v45 }
 0x5d6   : > { %1936 = vmatmul.mubr.msk.bf16.vlgmr.msra.gmra.mxu1 %vm1066_vm5, %v909_v41  ;;  %v2112_v41 = vld [vmem:[%s2791_s11 + $0x48] sm:$0xff]  }
 0x5d7   : > { %1459 = vmatprep.mubr.bf16.mxu1 %v2237_v30  ;;  %v2060_v30 = vld [vmem:[%s2790_s10 + $0xc4] ss:$16 sps:$4 sm:$0xff]   ;;  %1428 = vmatpush1.bf16.msra.mxu1 %v2055_v44 }
 0x5d8   : > { %1388 = vmatprep.subr.bf16.mxu0 %v2060_v30  ;;  %1429 = vmatprep.subr.bf16.mxu1 %v2063_v46  ;;  %v2115_v44 = vld [vmem:[%s2791_s11] sm:$0xff]  }
 0x5d9   : > { %1389 = vmatpush1.bf16.msra.mxu0 %v2058_v47 }
 0x5da   : > { %1390 = vmatprep.subr.bf16.mxu0 %v2066_v60 }
 0x5db   : > { %1430 = vmatpush1.bf16.msra.mxu1 %v2061_v48 }
 0x5dc   : > { %1431 = vmatprep.subr.bf16.mxu1 %v2069_v61 }
 0x5dd   : > { %1391 = vmatpush1.bf16.msra.mxu0 %v2064_v62 }
 0x5de   : > { %1392 = vmatprep.subr.bf16.mxu0 %v2072_v63 }
 0x5e1   : > { %1393 = vmatpush1.bf16.msra.mxu0 %v2070_v2 }
 0x5e2   : > { %1394 = vmatprep.subr.bf16.mxu0 %v2078_v4 }
 0x5e5   : > { %1395 = vmatpush1.bf16.msra.mxu0 %v2076_v5 }
 0x5e6   : > { %1396 = vmatprep.subr.bf16.mxu0 %v2084_v8 }
 0x5e9   : > { %1397 = vmatpush1.bf16.msra.mxu0 %v2082_v11 }
 0x5ea   : > { %1398 = vmatprep.subr.bf16.mxu0 %v2090_v13 }
 0x5ed   : > { %1399 = vmatpush1.bf16.msra.mxu0 %v2088_v9 }
 0x5ee   : > { %1400 = vmatprep.subr.bf16.mxu0 %v2096_v16 }
 0x5f1   : > { %1401 = vmatpush1.bf16.msra.mxu0 %v2094_v18 }
 0x5f2   : > { %1869 = vmatprep.subr.bf16.mxu0 %v2100_v28 }
 0x686   : > { %v1104_v49 = vpop.f32.mrf.mxu1 }
 0x688   : > { %v1925_v50 = vpop.f32.mrf.mxu1 }
 0x68a   : > { %v1107_v51 = vpop.f32.mrf.mxu1 }
 0x68c   : > { %v1926_v52 = vpop.f32.mrf.mxu1 }
 0x696   : > { %v1171_v53 = vpop.f32.mrf.mxu1 }
 0x697   : > { %v1172_v54 = vadd.f32 %v1171_v53, %v1104_v49 }
 0x698   : > { %v1937_v55 = vpop.f32.mrf.mxu1 }
 0x699   : > { %v2611_v56 = vadd.f32 %v1172_v54, %v2381_v0  ;;  %v2067_v0 = vld [vmem:[%s2790_s10 + $0xa8] ss:$16 sps:$4 sm:$0xff]  }
 0x69a   : > { %v1174_v57 = vpop.f32.mrf.mxu1  ;;  %1432 = vmatpush1.bf16.msra.mxu1 %v2067_v0 }
 0x69b   : > { %v1179_v58 = vmul.f32 %v2611_v56, %v2611_v56  ;;  %1433 = vmatprep.subr.bf16.mxu1 %v2075_v1 }
 0x69c   : > { %v1938_v59 = vpop.f32.mrf.mxu1 }
 0x69d   : > { %1180 = vadd.xlane.f32.xlu0 %v1179_v58 }
 0x69e   : > { %1434 = vmatpush1.bf16.msra.mxu1 %v2073_v3 }
 0x69f   : > { %1435 = vmatprep.subr.bf16.mxu1 %v2081_v7 }
 0x6a2   : > { %1436 = vmatpush1.bf16.msra.mxu1 %v2079_v6 }
 0x6a3   : > { %1437 = vmatprep.subr.bf16.mxu1 %v2087_v10 }
 0x6a6   : > { %1438 = vmatpush1.bf16.msra.mxu1 %v2085_v12 }
 0x6a7   : > { %1439 = vmatprep.subr.bf16.mxu1 %v2093_v14 }
 0x6aa   : > { %1440 = vmatpush1.bf16.msra.mxu1 %v2091_v15 }
 0x6ab   : > { %1441 = vmatprep.subr.bf16.mxu1 %v2099_v17 }
 0x6ae   : > { %1442 = vmatpush1.bf16.msra.mxu1 %v2097_v19 }
 0x726   : > { %v1181_v20 = vpop.xlane.xlu0 %1180 }
 0x727   : > { %v1182_v21 = vmul.f32 0.0078125, %v1181_v20 }
 0x729   : > { %v1183_v22 = vadd.f32 1e-06, %v1182_v21 }
 0x72b   : > { %2134 = vrsqrt.f32 %v1183_v22 }
 0x738   : > { %v2135_v23 = vpop.eup %2134 }
 0x739   : > { %v1185_v25 = vmul.f32 %v2135_v23, %v2611_v56 }
 0x73b   : > { %v1192_v26 = vmul.f32 %v1796_v24, %v1185_v25 }
 0x73d   : > { %v1193_v27 = vpack.c.bf16 %v1192_v26, %v1192_v26 }
 0x73f   : > { %1419 = vmatmul.mubr.bf16.vlgmr.msra.gmra.mxu0 %v1193_v27  ;;  %1460 = vmatmul.mubr.bf16.vlgmr.msra.gmra.mxu1 %v1193_v27 }
 0x740   : > { %1870 = vmatpush3.bf16.msra.mxu0 %v2101_v29 }
 0x741   : > { %1871 = vmatprep.subr.bf16.mxu0 %v2102_v31 }
 0x744   : > { %1872 = vmatpush3.bf16.msra.mxu0 %v2103_v32 }
 0x745   : > { %1873 = vmatprep.subr.bf16.mxu0 %v2104_v33 }
 0x748   : > { %1874 = vmatpush3.bf16.msra.mxu0 %v2105_v34 }
 0x749   : > { %1875 = vmatprep.subr.bf16.mxu0 %v2106_v35 }
 0x74c   : > { %1876 = vmatpush3.bf16.msra.mxu0 %v2107_v36 }
 0x74d   : > { %1877 = vmatprep.subr.bf16.mxu0 %v2108_v37 }
 0x750   : > { %1878 = vmatpush3.bf16.msra.mxu0 %v2109_v38 }
 0x751   : > { %1879 = vmatprep.subr.bf16.mxu0 %v2110_v39 }
 0x754   : > { %1880 = vmatpush3.bf16.msra.mxu0 %v2111_v40 }
 0x755   : > { %1881 = vmatprep.subr.bf16.mxu0 %v2112_v41 }
 0x758   : > { %1882 = vmatpush3.bf16.msra.mxu0 %v2113_v42 }
 0x759   : > { %1883 = vmatprep.subr.bf16.mxu0 %v2114_v43 }
 0x75c   : > { %1884 = vmatpush3.bf16.msra.mxu0 %v2115_v44 }
 0x7ff   : > { %v1420_v45 = vpop.f32.mrf.mxu0  ;;  %v1461_v30 = vpop.f32.mrf.mxu1 }
 0x800   : > { %v1829_v46 = vmul.f32 -1.442695, %v1420_v45 }
 0x801   : > { %v1422_v47 = vpop.f32.mrf.mxu0  ;;  %v1463_v48 = vpop.f32.mrf.mxu1 }
 0x802   : > { %2136 = vpow2.f32 %v1829_v46  ;;  %v1830_v49 = vmul.f32 -1.442695, %v1422_v47 }
 0x803   : > { %v1424_v50 = vpop.f32.mrf.mxu0  ;;  %v1465_v51 = vpop.f32.mrf.mxu1 }
 0x804   : > { %2138 = vpow2.f32 %v1830_v49 }
 0x805   : > { %v1425_v52 = vpop.f32.mrf.mxu0  ;;  %v1466_v53 = vpop.f32.mrf.mxu1 }
 0x80f   : > { %v2137_v54 = vpop.eup %2136 }
 0x810   : > { %v1474_v55 = vadd.f32 1.0, %v2137_v54 }
 0x811   : > { %v2139_v57 = vpop.eup %2138 }
 0x812   : > { %2140 = vrcp.f32 %v1474_v55  ;;  %v1475_v58 = vadd.f32 1.0, %v2139_v57 }
 0x814   : > { %2142 = vrcp.f32 %v1475_v58 }
 0x81f   : > { %v2141_v59 = vpop.eup %2140 }
 0x820   : > { %v1480_v60 = vmul.f32 %v2141_v59, %v1420_v45 }
 0x821   : > { %v2143_v61 = vpop.eup %2142 }
 0x822   : > { %v1481_v62 = vmul.f32 %v2143_v61, %v1422_v47  ;;  %v1482_v0 = vmul.f32 %v1480_v60, %v1461_v30 }
 0x824   : > { %v1483_v63 = vmul.f32 %v1481_v62, %v1463_v48  ;;  %v1484_v2 = vpack.c.bf16 %v1482_v0, %v1482_v0 }
 0x826   : > { %v1485_v1 = vpack.c.bf16 %v1483_v63, %v1483_v63 }
 0x828   : > { %1646 = vmatprep.mubr.bf16.mxu0 %v1485_v1 }
 0x829   : > { %1647 = vmatmul.mubr.bf16.vlgmr.msra.gmra.mxu0 %v1484_v2 }
 0x8e9   : > { %v1885_v3 = vpop.f32.mrf.mxu0 }
 0x8eb   : > { %v1886_v4 = vpop.f32.mrf.mxu0 }
 0x8ec   : > { %v1887_v5 = vadd.f32 %v1886_v4, %v1885_v3 }
 0x8ed   : > { %v1888_v6 = vpop.f32.mrf.mxu0 }
 0x8ee   : > { %v1654_v7 = vadd.f32 %v1887_v5, %v2611_v56 }
 0x8ef   : > { %v1889_v8 = vpop.f32.mrf.mxu0 }
 0x8f0   : > { %1655 = vst [vmem:[%s417_s29] sm:$0xff] %v1654_v7 }
 0x8f1   : > { %2183 = shalt.err (!%p2180_p0)
}
 0x8f2   : > { %s2184_s26 = scalar_lea.hbm %s2745_s15, 128  ;;  %s2188_s16 = scalar_lea.hbm %s2792_s12, 256 }
 0x8f3   : > { %p2185_p1 = scmp.ne.s32.totalorder %s2745_s15, %s2184_s26  ;;  %p2189_p4 = scmp.lt.s32.totalorder %s2745_s15, %s2792_s12 }
 0x8f4   : > { %p2190_p7 = scmp.lt.s32.totalorder %s2188_s16, %s2184_s26 }
 0x8f5   : > { %p2186_p2 = pnand %p2185_p1, %p2348_p5 }
 0x8f6   : > { %p2191_p8 = por %p2190_p7, %p2189_p4 }
 0x8f7   : > { %p2187_p3 = pneg %p2186_p2 }
 0x8f9   : > { %p2192_p6 = pnand %p2191_p8, %p2187_p3 }
 0x8fb   : > { %2195 = shalt.err (!%p2192_p6)
}
 0x8fc   : > { %1943 = dma.vmem_to_hbm [thread:$0]  (%p2348_p5), %s1671_s28, 128, %s2745_s15, %s1657_s7  }
 0x8fd PF: > { %p1955_p9 = scmp.ge.s32.totalorder %s2234_s24, 2  ;;  %s1682_s30 = sand.u32 1, %s2222_s21  }
 0x8fe   : > { %p2799_p10 = scmp.ne.s32.totalorder %s2796_s14, 0  ;;  %s1683_s17 = scalar_lea.sflag [#allocation4], %s1682_s30 }
 0x900   : > { %p1950_p11 = pnand %p1955_p9, %p2799_p10 }
 0x902   : > { %p1951_p12 = pneg %p1950_p11 }
 0x904   : > { %2217 = dma.done.wait (%p1951_p12), %s1683_s17, 128  }
 0x905   : > { %2219 = vsyncadd (%p1951_p12), %s1683_s17, 4294967168  ;;  %s2800_s20 = sld [smem:[#allocation8_spill]]  ;;  %p23_p13 = scmp.ge.s32.totalorder %s2335_s27, 4  }
 0x906   : > { %s2801_s21 = smov %s2226_s22  ;;  %s2802_s22 = smov %s2230_s23 }
 0x907   : > { %s2804_s24 = smov %s2335_s27  ;;  %25 = sbr.rel (!%p23_p13) target bundleno = 6 (0x6), region = 108 }
 0x90b   : > { %s2803_s23 = smov %s2800_s20 }
 0x90c   :  { %1688 = vsyncpa [#allocation3], 1 }
 0x90d   :  { %1690 = vsyncpa [#allocation3 + $0x1], 1 }
 0x90e   :  { %1691 = vsyncpa [#allocation4], 1 }
 0x90f   :  { %1693 = vsyncpa [#allocation4 + $0x1], 1 }

</bundles_post_ra>
